<compile_context>
chip_gen: v6e
topology: v6e:2x2x1
jax: 0.10.0
libtpu: 0.0.40
codegen_flags: <defaults>
</compile_context>

<pallas_src>
import functools

import jax
import jax.numpy as jnp
from jax.experimental import pallas as pl
from jax.experimental.pallas import tpu as pltpu


def _cdiv(a, b):
    return -(-a // b)


def _round_up(x, m):
    return (x + m - 1) // m * m


def _encoder_kernel(items_ref, emb_graph_ref, w_enc_ref, b_enc_ref,
                    h_ref, acc_ref, *, block_m, method):
    k = pl.program_id(1)

    @pl.when(k == 0)
    def _():
        acc_ref[...] = jnp.zeros_like(acc_ref)

    # int8 (0/1) -> bf16 on the VPU, then bf16 x bf16 -> f32 accumulate on the MXU.
    items = items_ref[...].astype(jnp.bfloat16)
    off = pl.multiple_of(k * block_m, 128)
    w_blk = w_enc_ref[pl.ds(off, block_m), :]        # slice of the VMEM-resident weight
    acc_ref[...] += jnp.dot(items, w_blk, preferred_element_type=jnp.float32)

    @pl.when(k == pl.num_programs(1) - 1)
    def _():
        emb_ae = acc_ref[...] + b_enc_ref[...]                   # [TB, Ep] f32
        g = emb_graph_ref[...]
        fused = g + emb_ae if method == "add" else g * emb_ae
        h_ref[...] = jax.nn.sigmoid(fused).astype(h_ref.dtype)


def _decoder_kernel(h_ref, w_dec_ref, b_dec_ref, out_ref):
    dec = jnp.dot(h_ref[...], w_dec_ref[...],
                  preferred_element_type=jnp.float32)            # [TB, TN] f32
    dec = dec + b_dec_ref[...]
    out_ref[...] = jax.nn.sigmoid(dec).astype(out_ref.dtype)


@functools.partial(jax.jit,
                   static_argnames=("method", "block_b", "block_m", "out_dtype"))
def graphae_forward(x_idx, rating_mat, graph_embeddings,
                    w_enc, b_enc, w_dec, b_dec, *,
                    method="add", block_b=None, block_m=None,
                    out_dtype=jnp.bfloat16):
    """Pallas-backed GraphAE forward (eval mode)."""
    if method not in ("add", "mm"):
        raise ValueError(f"unknown method {method!r}")
    (B,) = x_idx.shape
    _, M = rating_mat.shape
    E = graph_embeddings.shape[1]

    e_pad = _round_up(E, 128)                 # lane / MXU-K alignment

    # --- tile sizes ---------------------------------------------------------
    if block_m is None:
        block_m = 2048                        # mem-bound: big tiles amortize per-step cost
    block_m = min(_round_up(block_m, 128), _round_up(M, 128))
    if block_b is None:
        block_b = 512
        if B >= 64:                           # keep >= 2 batch tiles -> feed both v7x TCs
            block_b = min(block_b, _round_up(_cdiv(B, 2), 32))
    block_b = min(_round_up(block_b, 32), _round_up(B, 32))   # int8 sublane tile is 32

    nm = _cdiv(M, block_m)
    nb = _cdiv(B, block_b)
    m_pad = nm * block_m                      # only the (small) weights are padded to this
    b_pad = nb * block_b                      # rows of the h intermediate

    # --- per-generation VMEM limit (64 MiB physical on v7x, 128 MiB v5e/v6e) -
    try:
        vmem_cap = int(pltpu.get_tpu_info().vmem_capacity_bytes)
    except Exception:
        vmem_cap = 64 * 1024 * 1024
    if vmem_cap < 32 * 1024 * 1024:
        vmem_cap = 64 * 1024 * 1024
    vmem_limit = min(vmem_cap * 3 // 4, 100 * 1024 * 1024)

    # --- gathers (XLA) + small weight/bias prep -------------------------------
    # NOTE: the nn.Embedding(N, E) user lookup in the PyTorch forward is dead
    # code and is dropped.  rating_mat holds 0/1, so int8 is exact; storing
    # rating_mat as int8 upstream would also remove the f32 gather read.
    items = rating_mat[x_idx].astype(jnp.int8)                          # [B, M] int8
    emb_graph = jnp.pad(graph_embeddings[x_idx].astype(jnp.float32),
                        ((0, 0), (0, e_pad - E)))                       # [B, Ep] (small)
    # Zero padding of the weights is load-bearing: it cancels (a) the garbage
    # columns of the items edge block inside the K-reduction and (b) the 0.5
    # values in the padded-E columns of h at the decoder.
    w_enc_p = jnp.pad(w_enc.astype(jnp.bfloat16),
                      ((0, m_pad - M), (0, e_pad - E)))
    b_enc_p = jnp.pad(b_enc.astype(jnp.float32),
                      (0, e_pad - E)).reshape(1, e_pad)
    w_dec_p = jnp.pad(w_dec.astype(jnp.bfloat16),
                      ((0, e_pad - E), (0, m_pad - M)))
    b_dec_p = jnp.pad(b_dec.astype(jnp.float32),
                      (0, m_pad - M)).reshape(1, m_pad)

    # ---- kernel 1: encoder matmul (K-reduction over M) + graph fuse ---------
    h = pl.pallas_call(
        functools.partial(_encoder_kernel, block_m=block_m, method=method),
        out_shape=jax.ShapeDtypeStruct((b_pad, e_pad), jnp.bfloat16),
        grid=(nb, nm),
        in_specs=[
            pl.BlockSpec((block_b, block_m), lambda b, k: (b, k)),   # items (int8)
            pl.BlockSpec((block_b, e_pad),   lambda b, k: (b, 0)),   # graph emb
            pl.BlockSpec((m_pad, e_pad),     lambda b, k: (0, 0)),   # W_enc, VMEM-resident
            pl.BlockSpec((1, e_pad),         lambda b, k: (0, 0)),   # b_enc
        ],
        out_specs=pl.BlockSpec((block_b, e_pad), lambda b, k: (b, 0)),
        scratch_shapes=[pltpu.VMEM((block_b, e_pad), jnp.float32)],
        compiler_params=pltpu.CompilerParams(
            dimension_semantics=("parallel", "arbitrary"),
            vmem_limit_bytes=vmem_limit),
    )(items, emb_graph, w_enc_p, b_enc_p)

    # ---- kernel 2: decoder ----------------------------------------------------
    # Grid order (n, b): W_dec / b_dec tile indices are constant along the inner
    # b axis, so each weight tile is DMA'd from HBM exactly once; only the tiny
    # h blocks are re-streamed per n.  Out-of-bounds tails of the (B, M) output
    # blocks are dropped on store, so no wrapper-side slice is needed.
    out = pl.pallas_call(
        _decoder_kernel,
        out_shape=jax.ShapeDtypeStruct((B, M), out_dtype),
        grid=(nm, nb),
        in_specs=[
            pl.BlockSpec((block_b, e_pad), lambda n, b: (b, 0)),     # h
            pl.BlockSpec((e_pad, block_m), lambda n, b: (0, n)),     # W_dec tile
            pl.BlockSpec((1, block_m),     lambda n, b: (0, n)),     # b_dec tile
        ],
        out_specs=pl.BlockSpec((block_b, block_m), lambda n, b: (b, n)),
        compiler_params=pltpu.CompilerParams(
            dimension_semantics=("parallel", "parallel"),
            vmem_limit_bytes=vmem_limit),
    )(h, w_dec_p, b_dec_p)

    return out


def _reference_forward(x_idx, rating_mat, graph_embeddings,
                       w_enc, b_enc, w_dec, b_dec, *, method="add"):
    """Pure-JAX reference following the same bf16/f32 numerics path."""
    items = rating_mat[x_idx].astype(jnp.bfloat16)
    emb_ae = jnp.dot(items, w_enc.astype(jnp.bfloat16),
                     preferred_element_type=jnp.float32) + b_enc
    g = graph_embeddings[x_idx].astype(jnp.float32)
    fused = g + emb_ae if method == "add" else g * emb_ae
    h = jax.nn.sigmoid(fused).astype(jnp.bfloat16)
    dec = jnp.dot(h, w_dec.astype(jnp.bfloat16),
                  preferred_element_type=jnp.float32) + b_dec
    return jax.nn.sigmoid(dec)


if __name__ == "__main__":
    # Small deterministic setup consistent with GraphAE.__init__:
    #   rating_mat: [N, M], embedding_size E, batch of user indices x: [B]
    N, M, E, B = 40, 300, 24, 48

    key = jax.random.PRNGKey(0)
    k_rm, k_ge, k_we, k_be, k_wd, k_bd, k_x = jax.random.split(key, 7)

    rating_mat = (jax.random.uniform(k_rm, (N, M)) > 0.5).astype(jnp.float32)

    # Graph.embeddings buffer: eval-mode node-embedding table.
    graph_embeddings = 0.1 * jax.random.normal(k_ge, (N, E), dtype=jnp.float32)

    # encoder Linear(M, E), stored pre-transposed as [M, E]
    lim_e = 1.0 / jnp.sqrt(jnp.float32(M))
    w_enc = jax.random.uniform(k_we, (M, E), minval=-lim_e, maxval=lim_e,
                               dtype=jnp.float32)
    b_enc = jax.random.uniform(k_be, (E,), minval=-lim_e, maxval=lim_e,
                               dtype=jnp.float32)

    # decoder Linear(E, M), stored as [E, M]
    lim_d = 1.0 / jnp.sqrt(jnp.float32(E))
    w_dec = jax.random.uniform(k_wd, (E, M), minval=-lim_d, maxval=lim_d,
                               dtype=jnp.float32)
    b_dec = jax.random.uniform(k_bd, (M,), minval=-lim_d, maxval=lim_d,
                               dtype=jnp.float32)

    x_idx = jax.random.randint(k_x, (B,), 0, N)

    # Case 1: small explicit tiles -> multi-step K-reduction (nm=3), two batch
    # tiles (nb=2), and edge masking along both B (48 vs 64) and M (300 vs 384);
    # bf16 output (default).
    out1 = graphae_forward(x_idx, rating_mat, graph_embeddings,
                           w_enc, b_enc, w_dec, b_dec,
                           method="add", block_b=32, block_m=128)
    out1 = jax.block_until_ready(out1)
    ref1 = _reference_forward(x_idx, rating_mat, graph_embeddings,
                              w_enc, b_enc, w_dec, b_dec, method="add")
    assert out1.shape == (B, M), out1.shape
    assert out1.dtype == jnp.bfloat16, out1.dtype
    err1 = float(jnp.max(jnp.abs(out1.astype(jnp.float32) - ref1)))
    assert err1 < 1e-2, err1

    # Case 2: adaptive default tiles (single-tile grids), 'mm' fuse, f32 output.
    out2 = graphae_forward(x_idx, rating_mat, graph_embeddings,
                           w_enc, b_enc, w_dec, b_dec,
                           method="mm", out_dtype=jnp.float32)
    out2 = jax.block_until_ready(out2)
    ref2 = _reference_forward(x_idx, rating_mat, graph_embeddings,
                              w_enc, b_enc, w_dec, b_dec, method="mm")
    assert out2.shape == (B, M), out2.shape
    err2 = float(jnp.max(jnp.abs(out2 - ref2)))
    assert err2 < 1e-2, err2

    print("KERNEL_OK")
</pallas_src>

<mosaic_0001>
module attributes {stable_mosaic.version = 11 : i64} {
  func.func @_encoder_kernel(%arg0: i32, %arg1: i32, %arg2: memref<32x128xi8, #tpu.memory_space<vmem>>, %arg3: memref<32x128xf32, #tpu.memory_space<vmem>>, %arg4: memref<384x128xbf16, #tpu.memory_space<vmem>>, %arg5: memref<1x128xf32, #tpu.memory_space<vmem>>, %arg6: memref<32x128xbf16, #tpu.memory_space<vmem>>, %arg7: memref<32x128xf32, #tpu.memory_space<vmem>>) attributes {dimension_semantics = [#tpu.dimension_semantics<parallel>, #tpu.dimension_semantics<arbitrary>], iteration_bounds = array<i64: 2, 3>, scalar_prefetch = 0 : i64, scratch_operands = 1 : i64, tpu.core_type = #tpu.core_type<tc>, window_params = [{transform_indices = @transform_0, window_bounds = array<i64: 32, 128>}, {transform_indices = @transform_1, window_bounds = array<i64: 32, 128>}, {pipeline_mode = #tpu.pipeline_mode<synchronous>, transform_indices = @transform_2, window_bounds = array<i64: 384, 128>}, {pipeline_mode = #tpu.pipeline_mode<synchronous>, transform_indices = @transform_3, window_bounds = array<i64: 1, 128>}, {transform_indices = @transform_4, window_bounds = array<i64: 32, 128>}]} {
    %c0_i32 = arith.constant 0 : i32
    %0 = arith.cmpi eq, %arg1, %c0_i32 : i32
    %1 = arith.extui %0 : i1 to i32
    %c0_i32_0 = arith.constant 0 : i32
    %2 = arith.cmpi ne, %1, %c0_i32_0 : i32
    scf.if %2 {
      %cst_8 = arith.constant 0.000000e+00 : f32
      %16 = vector.broadcast %cst_8 : f32 to vector<32x128xf32>
      %c0_9 = arith.constant 0 : index
      %c0_10 = arith.constant 0 : index
      %17 = vector.load %arg7[%c0_9, %c0_10] : memref<32x128xf32, #tpu.memory_space<vmem>>, vector<32x128xf32>
      tpu.vector_store %arg7[%c0_9, %c0_10], %16 {strides = array<i32>} : memref<32x128xf32, #tpu.memory_space<vmem>>, vector<32x128xf32>,
    } else {
    }
    %c0 = arith.constant 0 : index
    %c0_1 = arith.constant 0 : index
    %3 = vector.load %arg2[%c0, %c0_1] : memref<32x128xi8, #tpu.memory_space<vmem>>, vector<32x128xi8>
    %4 = arith.sitofp %3 : vector<32x128xi8> to vector<32x128xbf16>
    %c128_i32 = arith.constant 128 : i32
    %5 = arith.muli %arg1, %c128_i32 : i32
    %6 = tpu.assume_multiple %5, 128 : i32
    %7 = arith.index_cast %6 : i32 to index
    %c0_2 = arith.constant 0 : index
    %8 = vector.load %arg4[%7, %c0_2] : memref<384x128xbf16, #tpu.memory_space<vmem>>, vector<128x128xbf16>
    %c0_3 = arith.constant 0 : index
    %c0_4 = arith.constant 0 : index
    %9 = vector.load %arg7[%c0_3, %c0_4] : memref<32x128xf32, #tpu.memory_space<vmem>>, vector<32x128xf32>
    %cst = arith.constant dense<0.000000e+00> : vector<32x128xf32>
    %10 = tpu.matmul %4, %8, %cst {dimension_numbers = #tpu.dot_dimension_numbers<[1], [0], [0], [1], [0, 0, 1, 1], [], []>} : vector<32x128xbf16>, vector<128x128xbf16>, vector<32x128xf32> -> vector<32x128xf32>
    %11 = arith.addf %9, %10 : vector<32x128xf32>
    %c0_5 = arith.constant 0 : index
    %c0_6 = arith.constant 0 : index
    %12 = vector.load %arg7[%c0_5, %c0_6] : memref<32x128xf32, #tpu.memory_space<vmem>>, vector<32x128xf32>
    tpu.vector_store %arg7[%c0_5, %c0_6], %11 {strides = array<i32>} : memref<32x128xf32, #tpu.memory_space<vmem>>, vector<32x128xf32>,
    %c2_i32 = arith.constant 2 : i32
    %13 = arith.cmpi eq, %arg1, %c2_i32 : i32
    %14 = arith.extui %13 : i1 to i32
    %c0_i32_7 = arith.constant 0 : i32
    %15 = arith.cmpi ne, %14, %c0_i32_7 : i32
    scf.if %15 {
      %c0_8 = arith.constant 0 : index
      %c0_9 = arith.constant 0 : index
      %16 = vector.load %arg7[%c0_8, %c0_9] : memref<32x128xf32, #tpu.memory_space<vmem>>, vector<32x128xf32>
      %c0_10 = arith.constant 0 : index
      %c0_11 = arith.constant 0 : index
      %17 = vector.load %arg5[%c0_10, %c0_11] : memref<1x128xf32, #tpu.memory_space<vmem>>, vector<1x128xf32>
      %18 = vector.broadcast %17 : vector<1x128xf32> to vector<32x128xf32>
      %19 = arith.addf %16, %18 : vector<32x128xf32>
      %c0_12 = arith.constant 0 : index
      %c0_13 = arith.constant 0 : index
      %20 = vector.load %arg3[%c0_12, %c0_13] : memref<32x128xf32, #tpu.memory_space<vmem>>, vector<32x128xf32>
      %21 = arith.addf %20, %19 : vector<32x128xf32>
      %22 = arith.negf %21 : vector<32x128xf32>
      %23 = math.exp %22 : vector<32x128xf32>
      %cst_14 = arith.constant 1.000000e+00 : f32
      %24 = vector.broadcast %cst_14 : f32 to vector<32x128xf32>
      %25 = arith.addf %24, %23 : vector<32x128xf32>
      %26 = arith.divf %24, %25 : vector<32x128xf32>
      %27 = arith.truncf %26 : vector<32x128xf32> to vector<32x128xbf16>
      %c0_15 = arith.constant 0 : index
      %c0_16 = arith.constant 0 : index
      %28 = vector.load %arg6[%c0_15, %c0_16] : memref<32x128xbf16, #tpu.memory_space<vmem>>, vector<32x128xbf16>
      tpu.vector_store %arg6[%c0_15, %c0_16], %27 {strides = array<i32>} : memref<32x128xbf16, #tpu.memory_space<vmem>>, vector<32x128xbf16>,
    } else {
    }
    return
  }
  func.func @transform_0(%arg0: i32, %arg1: i32) -> (i32, i32) {
    %c0_i32 = arith.constant 0 : i32
    return %arg0, %arg1 : i32, i32
  }
  func.func @transform_1(%arg0: i32, %arg1: i32) -> (i32, i32) {
    %c0_i32 = arith.constant 0 : i32
    %c0_i32_0 = arith.constant 0 : i32
    return %arg0, %c0_i32 : i32, i32
  }
  func.func @transform_2(%arg0: i32, %arg1: i32) -> (i32, i32) {
    %c0_i32 = arith.constant 0 : i32
    %c0_i32_0 = arith.constant 0 : i32
    %c0_i32_1 = arith.constant 0 : i32
    return %c0_i32, %c0_i32_0 : i32, i32
  }
  func.func @transform_3(%arg0: i32, %arg1: i32) -> (i32, i32) {
    %c0_i32 = arith.constant 0 : i32
    %c0_i32_0 = arith.constant 0 : i32
    %c0_i32_1 = arith.constant 0 : i32
    return %c0_i32, %c0_i32_0 : i32, i32
  }
  func.func @transform_4(%arg0: i32, %arg1: i32) -> (i32, i32) {
    %c0_i32 = arith.constant 0 : i32
    %c0_i32_0 = arith.constant 0 : i32
    return %arg0, %c0_i32 : i32, i32
  }
}

module attributes {stable_mosaic.version = 11 : i64} {
  func.func @_decoder_kernel(%arg0: i32, %arg1: i32, %arg2: memref<32x128xbf16, #tpu.memory_space<vmem>>, %arg3: memref<128x128xbf16, #tpu.memory_space<vmem>>, %arg4: memref<1x128xf32, #tpu.memory_space<vmem>>, %arg5: memref<32x128xbf16, #tpu.memory_space<vmem>>) attributes {dimension_semantics = [#tpu.dimension_semantics<parallel>, #tpu.dimension_semantics<parallel>], iteration_bounds = array<i64: 3, 2>, scalar_prefetch = 0 : i64, scratch_operands = 0 : i64, tpu.core_type = #tpu.core_type<tc>, window_params = [{transform_indices = @transform_0, window_bounds = array<i64: 32, 128>}, {transform_indices = @transform_1, window_bounds = array<i64: 128, 128>}, {transform_indices = @transform_2, window_bounds = array<i64: 1, 128>}, {transform_indices = @transform_3, window_bounds = array<i64: 32, 128>}]} {
    %c0 = arith.constant 0 : index
    %c0_0 = arith.constant 0 : index
    %0 = vector.load %arg2[%c0, %c0_0] : memref<32x128xbf16, #tpu.memory_space<vmem>>, vector<32x128xbf16>
    %c0_1 = arith.constant 0 : index
    %c0_2 = arith.constant 0 : index
    %1 = vector.load %arg3[%c0_1, %c0_2] : memref<128x128xbf16, #tpu.memory_space<vmem>>, vector<128x128xbf16>
    %cst = arith.constant dense<0.000000e+00> : vector<32x128xf32>
    %2 = tpu.matmul %0, %1, %cst {dimension_numbers = #tpu.dot_dimension_numbers<[1], [0], [0], [1], [0, 0, 1, 1], [], []>} : vector<32x128xbf16>, vector<128x128xbf16>, vector<32x128xf32> -> vector<32x128xf32>
    %c0_3 = arith.constant 0 : index
    %c0_4 = arith.constant 0 : index
    %3 = vector.load %arg4[%c0_3, %c0_4] : memref<1x128xf32, #tpu.memory_space<vmem>>, vector<1x128xf32>
    %4 = vector.broadcast %3 : vector<1x128xf32> to vector<32x128xf32>
    %5 = arith.addf %2, %4 : vector<32x128xf32>
    %6 = arith.negf %5 : vector<32x128xf32>
    %7 = math.exp %6 : vector<32x128xf32>
    %cst_5 = arith.constant 1.000000e+00 : f32
    %8 = vector.broadcast %cst_5 : f32 to vector<32x128xf32>
    %9 = arith.addf %8, %7 : vector<32x128xf32>
    %10 = arith.divf %8, %9 : vector<32x128xf32>
    %11 = arith.truncf %10 : vector<32x128xf32> to vector<32x128xbf16>
    %c0_6 = arith.constant 0 : index
    %c0_7 = arith.constant 0 : index
    %12 = vector.load %arg5[%c0_6, %c0_7] : memref<32x128xbf16, #tpu.memory_space<vmem>>, vector<32x128xbf16>
    tpu.vector_store %arg5[%c0_6, %c0_7], %11 {strides = array<i32>} : memref<32x128xbf16, #tpu.memory_space<vmem>>, vector<32x128xbf16>,
    return
  }
  func.func @transform_0(%arg0: i32, %arg1: i32) -> (i32, i32) {
    %c0_i32 = arith.constant 0 : i32
    %c0_i32_0 = arith.constant 0 : i32
    return %arg1, %c0_i32 : i32, i32
  }
  func.func @transform_1(%arg0: i32, %arg1: i32) -> (i32, i32) {
    %c0_i32 = arith.constant 0 : i32
    %c0_i32_0 = arith.constant 0 : i32
    return %c0_i32, %arg0 : i32, i32
  }
  func.func @transform_2(%arg0: i32, %arg1: i32) -> (i32, i32) {
    %c0_i32 = arith.constant 0 : i32
    %c0_i32_0 = arith.constant 0 : i32
    return %c0_i32, %arg0 : i32, i32
  }
  func.func @transform_3(%arg0: i32, %arg1: i32) -> (i32, i32) {
    %c0_i32 = arith.constant 0 : i32
    return %arg1, %arg0 : i32, i32
  }
}

</mosaic_0001>

<bundles_post_ra>
// kernel: graphae_forward.3
= control target key start
LH: loop header
LB: loop body
LE: loop exit
PB: predicated region body
PF: predicated region fallthrough
CT: control target
= control target key end

     0   :  { %8 = vsyncpa [#allocation4], 0  ;;  %s1181_s0 = inlined_call_operand.vmem [shape: bf16[64,128], index: 0, kind: input, shape index: {}]   ;;  %s1182_s1 = inlined_call_operand.vmem [shape: bf16[128,384], index: 1, kind: input, shape index: {}]   ;;  %s1183_s2 = inlined_call_operand.vmem [shape: f32[1,384], index: 2, kind: input, shape index: {}]   ;;  %s1184_s3 = inlined_call_operand.hbm [shape: bf16[48,300], index: 3, kind: output, shape index: {}]  }
   0x1   :  { %10 = vsyncpa [#allocation4 + $0x1], 0  ;;  %s967_s12 = smov 0   ;;  %s969_s13 = smov 0  }
   0x2   :  { %s971_s14 = smov 0   ;;  %s973_s15 = smov 0  }
   0x3   :  { %s975_s16 = smov 0   ;;  %s977_s17 = smov 0  }
   0x4   :  { %s979_s18 = smov 0   ;;  %s981_s19 = smov 0  }
   0x5   :  { %s983_s20 = smov 0   ;;  %s985_s21 = smov 0  }
   0x6 LB: > { %s632_s22 = sadd.s32 4294967295, %s941_s21   ;;  %s633_s23 = sadd.s32 4294967294, %s941_s21   ;;  %s941_s21 = sphi %s985_s21, %s16_s21   ;;  %s937_s20 = sphi %s983_s20, %s1196_s20   ;;  %s933_s19 = sphi %s981_s19, %s1195_s19   ;;  %s929_s18 = sphi %s979_s18, %s1194_s18   ;;  %s925_s17 = sphi %s977_s17, %s1193_s17   ;;  %s921_s16 = sphi %s975_s16, %s1192_s16   ;;  %s917_s15 = sphi %s973_s15, %s1191_s15   ;;  %s913_s14 = sphi %s971_s14, %s1190_s14   ;;  %s909_s13 = sphi %s969_s13, %s1189_s13   ;;  %s905_s12 = sphi %s967_s12, %s1188_s12  }
   0x7   : > { %s25_s24 = sadd.s32 1, %s933_s19  ;;  %s28_s25 = sadd.s32 1, %s937_s20 }
   0x8   : > { %p26_p0 = scmp.ge.s32.totalorder %s25_s24, 2  ;;  %s61_s26 = sadd.s32 1, %s921_s16 }
   0x9   : > { %p68_p1 = scmp.ne.s32.totalorder %s921_s16, %s917_s15  ;;  %p69_p2 = scmp.eq.s32.totalorder %s941_s21, 0 }
   0xa   : > { %s1198_s24 = smov (%p26_p0, %s25_s24), 0  ;;  %s1200_s25 = smov (!%p26_p0, %s28_s25), %s937_s20 }
   0xb   : > { %p1028_p3 = por %p69_p2, %p68_p1  ;;  %s110_s28 = ssub.s32 %s933_s19, %s1198_s24 }
   0xc   : > { %p30_p4 = scmp.ge.s32.totalorder %s1200_s25, 3  ;;  %s115_s29 = sadd.s32 1, %s913_s14 }
   0xd   : > { %p125_p5 = scmp.ne.s32.totalorder %s913_s14, %s909_s13  ;;  %p126_p6 = scmp.eq.s32.totalorder %s632_s22, 5 }
   0xe   : > { %s1202_s25 = smov (%p30_p4, %s1200_s25), 0  ;;  %p131_p8 = scmp.ne.s32.totalorder %s909_s13, %s905_s12 }
   0xf   : > { %p1039_p7 = por %p126_p6, %p125_p5  ;;  %s58_s4 = ssub.s32 %s937_s20, %s1202_s25 }
  0x10   : > { %p132_p9 = scmp.eq.s32.totalorder %s633_s23, 5  ;;  %p59_p10 = scmp.eq.s32.totalorder %s58_s4, 0 }
  0x11   : > { %s112_s5 = sor.u32 %s110_s28, %s58_s4  ;;  %p635_p13 = scmp.ge.s32.totalorder %s941_s21, 6 }
  0x12   : > { %p113_p11 = scmp.eq.s32.totalorder %s112_s5, 0  ;;  %p1047_p12 = por %p132_p9, %p131_p8 }
  0x13   : > { %s1052_s7 = scalar_select %p59_p10, %s921_s16, %s61_s26  }
  0x14   : > { %s1055_s8 = scalar_select %p113_p11, %s913_s14, %s115_s29  }
  0x15   : > { %148 = sbr.rel (%p635_p13) target bundleno = 40 (0x28), region = 16 }
  0x1a   : > { %160 = sbr.rel (!%p1028_p3) target bundleno = 40 (0x28), region = 24  ;;  %s162_s9 = sand.u32 (%p1028_p3), 1, %s921_s16  }
  0x1b   : > { %s637_s10 = sshll.u32 (%p1028_p3), %s937_s20, 2  ;;  %s636_s11 = sshll.u32 (%p1028_p3), %s162_s9, 6 }
  0x1c   : > { %s1065_s28 = scalar_lea.vmem (%p1028_p3), %s1182_s1, %s637_s10  ;;  %s164_s26 = scalar_lea.vmem (%p1028_p3), [#allocation2], %s636_s11 }
  0x1d   : > { %v183_v0 = vld [vmem:[%s1065_s28] sm:$0xf] (%p1028_p3)  ;;  %v185_v1 = vld [vmem:[%s1065_s28 + $0xc] sm:$0xf] (%p1028_p3)  ;;  %v187_v2 = vld [vmem:[%s1065_s28 + $0x18] sm:$0xf] (%p1028_p3) }
  0x1e   : > { %184 = vst [vmem:[%s164_s26] sm:$0xf] (%p1028_p3), %v183_v0  ;;  %186 = vst [vmem:[%s164_s26 + $0x4] sm:$0xf] (%p1028_p3), %v185_v1  ;;  %v189_v3 = vld [vmem:[%s1065_s28 + $0x24] sm:$0xf] (%p1028_p3) }
  0x1f   : > { %v191_v4 = vld [vmem:[%s1065_s28 + $0x30] sm:$0xf]  ;;  %188 = vst [vmem:[%s164_s26 + $0x8] sm:$0xf] %v187_v2  ;;  %190 = vst [vmem:[%s164_s26 + $0xc] sm:$0xf] %v189_v3 }
  0x20   : > { %192 = vst [vmem:[%s164_s26 + $0x10] sm:$0xf] %v191_v4  ;;  %v193_v5 = vld [vmem:[%s1065_s28 + $0x3c] sm:$0xf]  ;;  %v195_v6 = vld [vmem:[%s1065_s28 + $0x48] sm:$0xf] }
  0x21   : > { %v197_v7 = vld [vmem:[%s1065_s28 + $0x54] sm:$0xf]  ;;  %194 = vst [vmem:[%s164_s26 + $0x14] sm:$0xf] %v193_v5  ;;  %196 = vst [vmem:[%s164_s26 + $0x18] sm:$0xf] %v195_v6 }
  0x22   : > { %198 = vst [vmem:[%s164_s26 + $0x1c] sm:$0xf] %v197_v7  ;;  %v199_v8 = vld [vmem:[%s1065_s28 + $0x60] sm:$0xf]  ;;  %v201_v9 = vld [vmem:[%s1065_s28 + $0x6c] sm:$0xf] }
  0x23   : > { %v203_v10 = vld [vmem:[%s1065_s28 + $0x78] sm:$0xf]  ;;  %200 = vst [vmem:[%s164_s26 + $0x20] sm:$0xf] %v199_v8  ;;  %202 = vst [vmem:[%s164_s26 + $0x24] sm:$0xf] %v201_v9 }
  0x24   : > { %204 = vst [vmem:[%s164_s26 + $0x28] sm:$0xf] %v203_v10  ;;  %v205_v11 = vld [vmem:[%s1065_s28 + $0x84] sm:$0xf]  ;;  %v207_v12 = vld [vmem:[%s1065_s28 + $0x90] sm:$0xf] }
  0x25   : > { %v209_v13 = vld [vmem:[%s1065_s28 + $0x9c] sm:$0xf]  ;;  %206 = vst [vmem:[%s164_s26 + $0x2c] sm:$0xf] %v205_v11  ;;  %208 = vst [vmem:[%s164_s26 + $0x30] sm:$0xf] %v207_v12 }
  0x26   : > { %210 = vst [vmem:[%s164_s26 + $0x34] sm:$0xf] %v209_v13  ;;  %v211_v14 = vld [vmem:[%s1065_s28 + $0xa8] sm:$0xf]  ;;  %v213_v15 = vld [vmem:[%s1065_s28 + $0xb4] sm:$0xf] }
  0x27   : > { %212 = vst [vmem:[%s164_s26 + $0x38] sm:$0xf] %v211_v14  ;;  %214 = vst [vmem:[%s164_s26 + $0x3c] sm:$0xf] %v213_v15 }
  0x28 PF: > { %p638_p0 = scmp.ge.s32.totalorder %s941_s21, 1  ;;  %p275_p1 = scmp.lt.s32.totalorder %s941_s21, 7 }
  0x2a   : > { %p276_p2 = pnand %p638_p0, %p275_p1 }
  0x2b   : > { %s282_s27 = sand.u32 (!%p276_p2), 1, %s917_s15   ;;  %s1087_s29 = sshll.u32 (!%p276_p2), %s925_s17, 2 }
  0x2c   : > { %279 = sbr.rel (%p276_p2) target bundleno = 347 (0x15b), region = 69  ;;  %s639_s4 = sshll.u32 (!%p276_p2), %s282_s27, 6 }
  0x2d   : > { %p314_p3 = scmp.lt.s32.totalorder (!%p276_p2), %s1087_s29, 7  ;;  %s284_s5 = scalar_lea.vmem (!%p276_p2), [#allocation2], %s639_s4 }
  0x2e   : > { %s310_s15 = sand.u32 (!%p276_p2), 1, %s909_s13   ;;  %p319_p4 = scmp.lt.s32.totalorder (!%p276_p2), %s929_s18, 2 }
  0x31   : > { %v807_v16 = vld [vmem:[%s284_s5 + $0x38] sm:$0xff]   ;;  %s315_s9 = scalar_select %p314_p3, %s1087_s29, 7  ;;  %v808_v17 = vld [vmem:[%s284_s5 + $0x30] sm:$0xff]   ;;  %v809_v18 = vld [vmem:[%s284_s5 + $0x28] sm:$0xff]  }
  0x32   : > { %697 = vmatprep.subr.bf16.mxu0 %v807_v16  ;;  %v810_v19 = vld [vmem:[%s284_s5 + $0x20] sm:$0xff]   ;;  %v811_v21 = vld [vmem:[%s284_s5 + $0x18] sm:$0xff]   ;;  %v812_v22 = vld [vmem:[%s284_s5 + $0x10] sm:$0xff]   ;;  %s320_s28 = scalar_select %p319_p4, %s929_s18, 2 }
  0x33   : > { %s642_s10 = sshll.u32 %s315_s9, 2  ;;  %698 = vmatpush3.bf16.msra.mxu0 %v807_v16  ;;  %v813_v23 = vld [vmem:[%s284_s5 + $0x8] sm:$0xff]   ;;  %v814_v24 = vld [vmem:[%s284_s5] sm:$0xff]   ;;  %s640_s5 = sshll.u32 %s310_s15, 4 }
  0x34   : > { %699 = vmatprep.subr.bf16.mxu0 %v808_v17  ;;  %s317_s23 = scalar_lea.vmem %s1181_s0, %s642_s10  ;;  %s321_s4 = scalar_lea.vmem %s1183_s2, %s320_s28 }
  0x35   : > { %v815_v20 = vld [vmem:[%s317_s23] sm:$0xff]   ;;  %v816_v25 = vld [vmem:[%s317_s23 + $0x8] sm:$0xff]   ;;  %s312_s9 = scalar_lea.vmem [#allocation3], %s640_s5  ;;  %s1104_s10 = scalar_lea.sflag [#allocation4], %s310_s15 }
  0x36   : > { %713 = vmatprep.mubr.bf16.mxu0 %v815_v20  ;;  %v643_v26 = vld [vmem:[%s321_s4] ss:$0 sm:$0xff]  ;;  %s517_s11 = ssub.s32 (%p1039_p7), 6, %s1087_s29 }
  0x37   : > { %700 = vmatpush3.bf16.msra.mxu0 %v808_v17  ;;  %p518_p5 = scmp.lt.s32.totalorder (%p1039_p7), %s517_s11, 4 }
  0x38   : > { %701 = vmatprep.subr.bf16.mxu0 %v809_v18 }
  0x3b   : > { %702 = vmatpush3.bf16.msra.mxu0 %v809_v18 }
  0x3c   : > { %703 = vmatprep.subr.bf16.mxu0 %v810_v19 }
  0x3f   : > { %704 = vmatpush3.bf16.msra.mxu0 %v810_v19 }
  0x40   : > { %705 = vmatprep.subr.bf16.mxu0 %v811_v21 }
  0x43   : > { %706 = vmatpush3.bf16.msra.mxu0 %v811_v21 }
  0x44   : > { %707 = vmatprep.subr.bf16.mxu0 %v812_v22 }
  0x47   : > { %708 = vmatpush3.bf16.msra.mxu0 %v812_v22 }
  0x48   : > { %709 = vmatprep.subr.bf16.mxu0 %v813_v23 }
  0x4b   : > { %710 = vmatpush3.bf16.msra.mxu0 %v813_v23 }
  0x4c   : > { %711 = vmatprep.subr.bf16.mxu0 %v814_v24 }
  0x4f   : > { %712 = vmatpush3.bf16.msra.mxu0 %v814_v24 }
  0x52   : > { %714 = vmatmul.mubr.bf16.vlgmr.msra.gmra.mxu0 %v816_v25 }
 0x112   : > { %v715_v27 = vpop.f32.mrf.mxu0 }
 0x113   : > { %v458_v28 = vadd.f32 %v715_v27, %v643_v26 }
 0x114   : > { %v449_v29 = vpop.f32.mrf.mxu0 }
 0x115   : > { %v656_v30 = vmul.f32 -1.442695, %v458_v28  ;;  %v450_v31 = vadd.f32 %v643_v26, %v449_v29 }
 0x116   : > { %v716_v32 = vpop.f32.mrf.mxu0 }
 0x117   : > { %817 = vpow2.f32 %v656_v30  ;;  %v654_v33 = vmul.f32 -1.442695, %v450_v31  ;;  %v461_v34 = vadd.f32 %v716_v32, %v643_v26 }
 0x118   : > { %v452_v35 = vpop.f32.mrf.mxu0 }
 0x119   : > { %819 = vpow2.f32 %v654_v33  ;;  %v657_v36 = vmul.f32 -1.442695, %v461_v34  ;;  %v453_v37 = vadd.f32 %v643_v26, %v452_v35 }
 0x11b   : > { %821 = vpow2.f32 %v657_v36  ;;  %v655_v38 = vmul.f32 -1.442695, %v453_v37 }
 0x11d   : > { %823 = vpow2.f32 %v655_v38 }
 0x124   : > { %v818_v39 = vpop.eup %817 }
 0x125   : > { %v478_v41 = vadd.f32 1.0, %v818_v39 }
 0x126   : > { %v820_v40 = vpop.eup %819 }
 0x127   : > { %v476_v43 = vadd.f32 1.0, %v820_v40  ;;  %825 = vrcp.f32 %v478_v41 }
 0x128   : > { %v822_v42 = vpop.eup %821 }
 0x129   : > { %v479_v44 = vadd.f32 1.0, %v822_v42 }
 0x12a   : > { %v824_v45 = vpop.eup %823 }
 0x12b   : > { %827 = vrcp.f32 %v479_v44  ;;  %v477_v46 = vadd.f32 1.0, %v824_v45 }
 0x12c   : > { %829 = vrcp.f32 %v476_v43 }
 0x12d   : > { %831 = vrcp.f32 %v477_v46 }
 0x134   : > { %v826_v47 = vpop.eup %825 }
 0x138   : > { %v828_v48 = vpop.eup %827 }
 0x139   : > { %v830_v49 = vpop.eup %829  ;;  %v684_v50 = vpack.c.bf16 %v828_v48, %v826_v47  ;;  %515 = sbr.rel (!%p1039_p7) target bundleno = 347 (0x15b), region = 77 }
 0x13a   : > { %v832_v51 = vpop.eup %831 }
 0x13b   : > { %686 = vst [vmem:[%s312_s9 + $0x8] sm:$0xff] %v684_v50   ;;  %v679_v52 = vpack.c.bf16 %v832_v51, %v830_v49 }
 0x13d   : > { %680 = vst [vmem:[%s312_s9] sm:$0xff] %v679_v52  }
 0x13e   : > { %s1204_s11 = smov (!%p518_p5, %s517_s11), 4 }
 0x13f   : > { %s1109_s22 = sshll.u32 %s1204_s11, 6 }
 0x140   : > { %s522_s23 = ssub.s32 256, %s1109_s22 }
 0x141   : > { %523 = vsyncadd %s1104_s10, %s522_s23  ;;  %p665_p6 = scmp.ne.s32.totalorder %s1109_s22, 0  ;;  %s717_s15 = smul.u32 12, %s925_s17 }
 0x142   : > { %s530_s28 = sshll.u32 %s312_s9, 4  ;;  %s943_s11 = smov [#allocation3]   ;;  %s1116_s28 = int_to_ptr.vmem [resolvable:$true] %s530_s28 }
 0x143   : > { %s526_s30 = sadd.s32 %s929_s18, %s717_s15  ;;  %s833_s5 = scalar_lea.vmem %s1116_s28, %s1109_s22 }
 0x144   : > { %s667_s29 = sshll.u32 %s526_s30, 6  ;;  %p834_p7 = scmp.ne.s32.totalorder %s1116_s28, %s833_s5 }
 0x145   : > { %s1121_s4 = scalar_lea.hbm %s1184_s3, %s667_s29  ;;  %s837_s17 = sshll.u32 %s943_s11, 4  ;;  %s838_s17 = int_to_ptr.vmem [resolvable:$false] %s837_s17 }
 0x146   : > { %p835_p8 = pnand %p834_p7, %p665_p6  ;;  %s839_s18 = scalar_lea.vmem %s838_s17, 512 }
 0x147   : > { %p840_p10 = scmp.lt.s32.totalorder %s1116_s28, %s838_s17  ;;  %p841_p11 = scmp.lt.s32.totalorder %s839_s18, %s833_s5 }
 0x148   : > { %p836_p9 = pneg %p835_p8 }
 0x149   : > { %p842_p13 = por %p841_p11, %p840_p10 }
 0x14b   : > { %p843_p0 = pnand %p842_p13, %p836_p9 }
 0x14d   : > { %846 = shalt.err (!%p843_p0)
}
 0x14e   : > { %s847_s9 = scalar_lea.hbm %s1121_s4, %s1109_s22  ;;  %s851_s30 = scalar_lea.hbm %s1184_s3, 1152 }
 0x14f   : > { %p848_p1 = scmp.ne.s32.totalorder %s1121_s4, %s847_s9  ;;  %p852_p4 = scmp.lt.s32.totalorder %s1121_s4, %s1184_s3 }
 0x150   : > { %p853_p5 = scmp.lt.s32.totalorder %s851_s30, %s847_s9 }
 0x151   : > { %p849_p2 = pnand %p848_p1, %p665_p6 }
 0x152   : > { %p854_p7 = por %p853_p5, %p852_p4 }
 0x153   : > { %p850_p3 = pneg %p849_p2 }
 0x155   : > { %p855_p8 = pnand %p854_p7, %p850_p3 }
 0x157   : > { %858 = shalt.err (!%p855_p8)
}
 0x158   : > { %s944_s27 = smov 64   ;;  %s945_s5 = smov 192  }
 0x159   : > { %s946_s11 = smov 4  }
 0x15a   : > { %536 = dma.vmem_to_hbm [thread:$0]  (%p665_p6), %s1116_s28, %s1109_s22, %s1121_s4, %s1104_s10, %s944_s27, %s945_s5, %s946_s11  }
 0x15b PF: > { %p723_p9 = scmp.ge.s32.totalorder %s941_s21, 2  ;;  %s545_s17 = sand.u32 1, %s905_s12  }
 0x15c   : > { %s546_s18 = scalar_lea.sflag [#allocation4], %s545_s17 }
 0x15d   : > { %p720_p10 = pnand %p723_p9, %p1047_p12 }
 0x15f   : > { %p721_p11 = pneg %p720_p10 }
 0x161   : > { %900 = dma.done.wait (%p721_p11), %s546_s18, 256  }
 0x162   : > { %902 = vsyncadd (%p721_p11), %s546_s18, 4294967040  ;;  %s16_s21 = sadd.s32 1, %s941_s21   ;;  %s1188_s12 = smov %s909_s13 }
 0x163   : > { %p13_p13 = scmp.ge.s32.totalorder %s16_s21, 8   ;;  %s1189_s13 = smov %s913_s14 }
 0x164   : > { %s1190_s14 = smov %s1055_s8  ;;  %s1191_s15 = smov %s921_s16 }
 0x165   : > { %s1192_s16 = smov %s1052_s7  ;;  %s1193_s17 = smov %s933_s19 }
 0x166   : > { %s1194_s18 = smov %s937_s20  ;;  %s1195_s19 = smov %s1198_s24 }
 0x167   : > { %s1196_s20 = smov %s1202_s25  ;;  %15 = sbr.rel (!%p13_p13) target bundleno = 6 (0x6), region = 119 }
 0x16c   :  { %551 = vsyncpa [#allocation4], 1 }
 0x16d   :  { %553 = vsyncpa [#allocation4 + $0x1], 1 }

// kernel: graphae_forward.2
= control target key start
LH: loop header
LB: loop body
LE: loop exit
PB: predicated region body
PF: predicated region fallthrough
CT: control target
= control target key end

     0   :  { %s1139_s15 = smov 0   ;;  %s1141_s16 = smov 0   ;;  %s1303_s0 = inlined_call_operand.vmem [shape: s8[48,300], index: 0, kind: input, shape index: {}]   ;;  %s1304_s1 = inlined_call_operand.vmem [shape: f32[48,128], index: 1, kind: input, shape index: {}]   ;;  %s1305_s2 = inlined_call_operand.vmem [shape: bf16[384,128], index: 2, kind: input, shape index: {}]   ;;  %s1306_s3 = inlined_call_operand.vmem [shape: f32[1,128], index: 3, kind: input, shape index: {}]   ;;  %s1307_s4 = inlined_call_operand.vmem [shape: bf16[64,128], index: 4, kind: output, shape index: {}]  }
   0x1   :  { %s1143_s17 = smov 0   ;;  %s1145_s18 = smov 0  }
   0x2   :  { %s1147_s19 = smov 0   ;;  %s1149_s20 = smov 0  }
   0x3   :  { %s1151_s21 = smov 0  }
   0x4 LB: > { %s23_s22 = sadd.s32 1, %s1071_s19  ;;  %s26_s23 = sadd.s32 1, %s1075_s20  ;;  %s1079_s21 = sphi %s1151_s21, %s14_s21   ;;  %s1075_s20 = sphi %s1149_s20, %s1316_s20   ;;  %s1071_s19 = sphi %s1147_s19, %s1315_s19   ;;  %s1067_s18 = sphi %s1145_s18, %s1314_s18   ;;  %s1063_s17 = sphi %s1143_s17, %s1313_s17   ;;  %s1059_s16 = sphi %s1141_s16, %s1312_s16   ;;  %s1055_s15 = sphi %s1139_s15, %s1311_s15  }
   0x5   : > { %p24_p0 = scmp.ge.s32.totalorder %s23_s22, 3  ;;  %p42_p1 = scmp.ne.s32.totalorder %s1059_s16, %s1055_s15 }
   0x6   : > { %p43_p2 = scmp.eq.s32.totalorder %s1079_s21, 0  ;;  %s35_s27 = sadd.s32 1, %s1059_s16 }
   0x7   : > { %s1318_s22 = smov (%p24_p0, %s23_s22), 0  ;;  %s1320_s23 = smov (!%p24_p0, %s26_s23), %s1075_s20 }
   0x8   : > { %p44_p3 = por %p43_p2, %p42_p1  ;;  %p28_p4 = scmp.ge.s32.totalorder %s1320_s23, 2 }
   0x9   : > { %s31_s24 = ssub.s32 %s1071_s19, %s1318_s22  ;;  %p755_p6 = scmp.ge.s32.totalorder %s1079_s21, 6 }
   0xa   : > { %s1322_s23 = smov (%p28_p4, %s1320_s23), 0 }
   0xb   : > { %s30_s25 = ssub.s32 %s1075_s20, %s1322_s23  ;;  %168 = sbr.rel (%p755_p6) target bundleno = 63 (0x3f), region = 24 }
   0xc   : > { %s32_s26 = sor.u32 %s31_s24, %s30_s25 }
   0xd   : > { %p33_p5 = scmp.eq.s32.totalorder %s32_s26, 0 }
   0xf   : > { %s1190_s28 = scalar_select %p33_p5, %s1059_s16, %s35_s27  }
  0x10   : > { %171 = sbr.rel (!%p44_p3) target bundleno = 63 (0x3f), region = 28  ;;  %s173_s29 = sand.u32 (%p44_p3), 1, %s1059_s16  }
  0x11   : > { %s757_s30 = sshll.u32 (%p44_p3), %s1075_s20, 2  ;;  %s756_s5 = sshll.u32 (%p44_p3), %s173_s29, 3 }
  0x12   : > { %s177_s6 = ssub.s32 (%p44_p3), 6, %s757_s30  ;;  %s847_s7 = smul.u32 (%p44_p3), 12, %s1075_s20 }
  0x13   : > { %p178_p7 = scmp.lt.s32.totalorder (%p44_p3), %s177_s6, 4  ;;  %s1205_s14 = scalar_lea.vmem (%p44_p3), [#allocation3], %s756_s5  }
  0x14   : > { %s183_s8 = sadd.s32 (%p44_p3), %s1071_s19, %s847_s7 }
  0x15   : > { %s1324_s6 = smov (!%p178_p7, %s177_s6), 4  ;;  %s761_s10 = sshll.u32 %s183_s8, 1 }
  0x16   : > { %s758_s9 = sshll.u32 %s1324_s6, 5  ;;  %s1203_s13 = scalar_lea.vmem %s1303_s0, %s761_s10  }
  0x17   : > { %p762_p8 = scmp.eq.s32.totalorder %s758_s9, 0 }
  0x18   : > { %s1208_s24 = sshrl.u32 (!%p762_p8), %s1324_s6, 2 }
  0x19   : > { %188 = sbr.rel (%p762_p8) target bundleno = 63 (0x3f), region = 32  ;;  %p763_p9 = scmp.le.s32.totalorder (!%p762_p8), %s1208_s24, 0 }
  0x1e   : > { %691 = sbr.rel (%p763_p9) target bundleno = 47 (0x2f), region = 133  ;;  %s1308_s25 = smov (!%p763_p9), %s1205_s14 }
  0x1f   : > { %s1309_s26 = smov (!%p763_p9), %s1203_s13  ;;  %s1217_s27 = smov (!%p763_p9), 0  }
  0x20   : > { %s1219_s29 = smov (!%p763_p9), 0  }
  0x23 LB: >> { %v205_v0 = vld [vmem:[%s1087_s26] sm:$0x3]  ;;  %v207_v1 = vld [vmem:[%s1087_s26 + $0x6] sm:$0x3]  ;;  %v209_v2 = vld [vmem:[%s1087_s26 + $0xc] sm:$0x3]  ;;  %s1095_s29 = sphi %s1219_s29, %s199_s29   ;;  %s1091_s27 = sphi %s1217_s27, %s1310_s27   ;;  %s1087_s26 = sphi %s1309_s26, %s218_s26   ;;  %s1083_s25 = sphi %s1308_s25, %s219_s25  }
  0x24   : >> { %206 = vst [vmem:[%s1083_s25] sm:$0x3] %v205_v0  ;;  %208 = vst [vmem:[%s1083_s25 + $0x2] sm:$0x3] %v207_v1  ;;  %v211_v3 = vld [vmem:[%s1087_s26 + $0x12] sm:$0x3]  ;;  %s213_s30 = sadd.s32 1, %s1091_s27 }
  0x25   : >> { %210 = vst [vmem:[%s1083_s25 + $0x4] sm:$0x3] %v209_v2  ;;  %212 = vst [vmem:[%s1083_s25 + $0x6] sm:$0x3] %v211_v3  ;;  %p214_p10 = scmp.ge.s32.totalorder %s213_s30, %s1208_s24  ;;  %s199_s29 = sadd.s32 1, %s1095_s29  }
  0x26   : >> { %p198_p11 = scmp.ge.s32.totalorder %s199_s29, %s1208_s24 }
  0x27   : >> { %s1326_s30 = smov (%p214_p10, %s213_s30), 0 }
  0x28   : >> { %s216_s5 = smul.u32 24, %s1326_s30  ;;  %s764_s7 = sshll.u32 %s1326_s30, 3 }
  0x29   : >> { %s219_s25 = scalar_lea.vmem %s1205_s14, %s764_s7 [#allocation3]   ;;  %s1310_s27 = smov %s1326_s30 }
  0x2a   : >> { %s218_s26 = scalar_lea.vmem %s1203_s13, %s216_s5   ;;  %201 = sbr.rel (!%p198_p11) target bundleno = 35 (0x23), region = 139 }
  0x2f PF: > { %s1238_s8 = sand.u32 3, %s1324_s6   ;;  %s766_s9 = smul.u32 24, %s1208_s24 }
  0x30   : > { %s801_s10 = sshll.u32 %s1208_s24, 3  ;;  %p768_p12 = scmp.le.s32.totalorder %s1238_s8, 0 }
  0x31   : > { %s224_s11 = scalar_lea.vmem %s1203_s13, %s766_s9   ;;  %s226_s12 = scalar_lea.vmem %s1205_s14, %s801_s10 [#allocation3]  }
  0x32   : > { %705 = sbr.rel (%p768_p12) target bundleno = 63 (0x3f), region = 144  ;;  %s1097_s5 = smov (!%p768_p12), %s226_s12  }
  0x33   : > { %s1101_s30 = smov (!%p768_p12), %s224_s11   ;;  %s1105_s7 = smov (!%p768_p12), 0  }
  0x34   : > { %s1109_s29 = smov (!%p768_p12), 0  }
  0x37 LB: >> { %v236_v4 = vld [vmem:[%s1103_s30] sm:$0x3]  ;;  %s238_s6 = sadd.s32 1, %s1107_s7  ;;  %s230_s29 = sadd.s32 1, %s1111_s29   ;;  %s1111_s29 = sphi %s1109_s29, %s230_s29   ;;  %s1107_s7 = sphi %s1105_s7, %s1106_s7   ;;  %s1103_s30 = sphi %s1101_s30, %s243_s30   ;;  %s1099_s5 = sphi %s1097_s5, %s244_s5  }
  0x38   : >> { %237 = vst [vmem:[%s1099_s5] sm:$0x3] %v236_v4  ;;  %p239_p13 = scmp.ge.s32.totalorder %s238_s6, %s1238_s8  ;;  %p229_p0 = scmp.ge.s32.totalorder %s230_s29, %s1238_s8 }
  0x3a   : >> { %s1328_s6 = smov (%p239_p13, %s238_s6), 0  ;;  %232 = sbr.rel (!%p229_p0) target bundleno = 55 (0x37), region = 150 }
  0x3b   : >> { %s241_s13 = smul.u32 6, %s1328_s6  ;;  %s769_s14 = sshll.u32 %s1328_s6, 1 }
  0x3c   : >> { %s244_s5 = scalar_lea.vmem %s226_s12, %s769_s14 [#allocation3]   ;;  %s1106_s7 = smov %s1328_s6  }
  0x3d   : >> { %s243_s30 = scalar_lea.vmem %s224_s11, %s241_s13  }
  0x3f PF: > { %p770_p1 = scmp.ge.s32.totalorder %s1079_s21, 1  ;;  %p318_p2 = scmp.lt.s32.totalorder %s1079_s21, 7 }
  0x41   : > { %p319_p3 = pnand %p770_p1, %p318_p2 }
  0x42   : > { %s325_s24 = sand.u32 (!%p319_p3), 1, %s1055_s15   ;;  %s772_s25 = sshll.u32 (!%p319_p3), %s1067_s18, 2 }
  0x43   : > { %322 = sbr.rel (%p319_p3) target bundleno = 368 (0x170), region = 80  ;;  %s771_s26 = sshll.u32 (!%p319_p3), %s325_s24, 3 }
  0x44   : > { %p369_p4 = scmp.lt.s32.totalorder (!%p319_p3), %s772_s25, 5  ;;  %p379_p5 = scmp.lt.s32.totalorder (!%p319_p3), %s772_s25, 7 }
  0x45   : > { %s1261_s29 = scalar_lea.vmem (!%p319_p3), [#allocation3], %s771_s26  ;;  %p776_p6 = scmp.ne.s32.totalorder (!%p319_p3), %s1063_s17, 0 }
  0x48   : > { %s370_s27 = scalar_select %p369_p4, %s772_s25, 5 }
  0x49   : > { %s1330_s25 = smov (!%p379_p5, %s772_s25), 7  ;;  %388 = sbr.rel (%p776_p6) target bundleno = 81 (0x51), region = 88 }
  0x4a   : > { %s773_s9 = sshll.u32 %s370_s27, 3  ;;  %s775_s12 = sshll.u32 %s1330_s25, 2 }
  0x4b   : > { %s1254_s11 = scalar_lea.vmem %s1304_s1, %s773_s9  ;;  %s1259_s7 = scalar_lea.vmem %s1307_s4, %s775_s12 }
  0x4e   : > { %v1113_v5 = vmov 0.0  }
  0x4f   : > { %389 = vst [vmem:[#allocation2 + $0x10] sm:$0xff] %v1113_v5  ;;  %390 = vst [vmem:[#allocation2] sm:$0xff] %v1113_v5 }
  0x50   : > { %391 = vst [vmem:[#allocation2 + $0x18] sm:$0xff] %v1113_v5  ;;  %392 = vst [vmem:[#allocation2 + $0x8] sm:$0xff] %v1113_v5 }
  0x51 PF: > { %s777_s15 = sshll.u32 %s1063_s17, 7  ;;  %v393_v6 = vld [vmem:[%s1261_s29] sm:$0x3]  ;;  %v394_v7 = vld [vmem:[%s1261_s29 + $0x2] sm:$0x3]  ;;  %p789_p7 = scmp.ne.s32.totalorder %s1063_s17, 2 }
  0x52   : > { %s402_s18 = sshra.s32 %s777_s15, 3  ;;  %v397_v8 = vunpack.c.l.s8.bf16 %v393_v6  ;;  %v398_v9 = vunpack.c.l.s8.bf16 %v394_v7  ;;  %v395_v18 = vld [vmem:[%s1261_s29 + $0x4] sm:$0x3]  ;;  %v396_v19 = vld [vmem:[%s1261_s29 + $0x6] sm:$0x3] }
  0x53   : > { %s778_s6 = sshll.u32 %s402_s18, 2  ;;  %v399_v21 = vunpack.c.l.s8.bf16 %v395_v18  ;;  %v400_v22 = vunpack.c.l.s8.bf16 %v396_v19 }
  0x54   : > { %s405_s24 = scalar_lea.vmem %s1305_s2, %s778_s6  ;;  %v779_v10 = vcombine.low %v397_v8, %v398_v9 }
  0x55   : > { %v969_v11 = vld [vmem:[%s405_s24 + $0x38] sm:$0xff]   ;;  %v970_v12 = vld [vmem:[%s405_s24 + $0x30] sm:$0xff]   ;;  %v971_v13 = vld [vmem:[%s405_s24 + $0x28] sm:$0xff]   ;;  %v780_v23 = vcombine.low %v399_v21, %v400_v22 }
  0x56   : > { %843 = vmatprep.mubr.bf16.mxu0 %v779_v10  ;;  %827 = vmatprep.subr.bf16.mxu0 %v969_v11  ;;  %v972_v14 = vld [vmem:[%s405_s24 + $0x20] sm:$0xff]   ;;  %v973_v15 = vld [vmem:[%s405_s24 + $0x18] sm:$0xff]   ;;  %v974_v16 = vld [vmem:[%s405_s24 + $0x10] sm:$0xff]  }
  0x57   : > { %828 = vmatpush3.bf16.msra.mxu0 %v969_v11  ;;  %v975_v17 = vld [vmem:[%s405_s24 + $0x8] sm:$0xff]   ;;  %v976_v20 = vld [vmem:[%s405_s24] sm:$0xff]   ;;  %v424_v24 = vld [vmem:[#allocation2 + $0x18] sm:$0xff] }
  0x58   : > { %829 = vmatprep.subr.bf16.mxu0 %v970_v12  ;;  %v422_v26 = vld [vmem:[#allocation2 + $0x10] sm:$0xff]  ;;  %v425_v29 = vld [vmem:[#allocation2 + $0x8] sm:$0xff]  ;;  %v423_v32 = vld [vmem:[#allocation2] sm:$0xff] }
  0x5b   : > { %830 = vmatpush3.bf16.msra.mxu0 %v970_v12 }
  0x5c   : > { %831 = vmatprep.subr.bf16.mxu0 %v971_v13 }
  0x5f   : > { %832 = vmatpush3.bf16.msra.mxu0 %v971_v13 }
  0x60   : > { %833 = vmatprep.subr.bf16.mxu0 %v972_v14 }
  0x63   : > { %834 = vmatpush3.bf16.msra.mxu0 %v972_v14 }
  0x64   : > { %835 = vmatprep.subr.bf16.mxu0 %v973_v15 }
  0x67   : > { %836 = vmatpush3.bf16.msra.mxu0 %v973_v15 }
  0x68   : > { %837 = vmatprep.subr.bf16.mxu0 %v974_v16 }
  0x6b   : > { %838 = vmatpush3.bf16.msra.mxu0 %v974_v16 }
  0x6c   : > { %839 = vmatprep.subr.bf16.mxu0 %v975_v17 }
  0x6f   : > { %840 = vmatpush3.bf16.msra.mxu0 %v975_v17 }
  0x70   : > { %841 = vmatprep.subr.bf16.mxu0 %v976_v20 }
  0x73   : > { %842 = vmatpush3.bf16.msra.mxu0 %v976_v20 }
  0x76   : > { %844 = vmatmul.mubr.bf16.vlgmr.msra.gmra.mxu0 %v780_v23 }
 0x136   : > { %v845_v25 = vpop.f32.mrf.mxu0 }
 0x137   : > { %v537_v27 = vadd.f32 %v845_v25, %v424_v24 }
 0x138   : > { %v520_v28 = vpop.f32.mrf.mxu0 }
 0x139   : > { %541 = vst [vmem:[#allocation2 + $0x18] sm:$0xff] %v537_v27  ;;  %v535_v30 = vadd.f32 %v520_v28, %v422_v26 }
 0x13a   : > { %v846_v31 = vpop.f32.mrf.mxu0 }
 0x13b   : > { %539 = vst [vmem:[#allocation2 + $0x10] sm:$0xff] %v535_v30  ;;  %v538_v33 = vadd.f32 %v846_v31, %v425_v29  ;;  %546 = sbr.rel (%p789_p7) target bundleno = 368 (0x170), region = 92 }
 0x13c   : > { %v523_v34 = vpop.f32.mrf.mxu0 }
 0x13d   : > { %542 = vst [vmem:[#allocation2 + $0x8] sm:$0xff] %v538_v33  ;;  %v536_v35 = vadd.f32 %v523_v34, %v423_v32 }
 0x13f   : > { %540 = vst [vmem:[#allocation2] sm:$0xff] %v536_v35 }
 0x140   : > { %v790_v38 = vld [vmem:[%s1306_s3] ss:$0 sm:$0xff]  ;;  %v563_v42 = vld [vmem:[%s1254_s11 + $0x8] sm:$0xff]  ;;  %v549_v43 = vld [vmem:[#allocation2 + $0x18] sm:$0xff] }
 0x141   : > { %v562_v41 = vld [vmem:[%s1254_s11] sm:$0xff]  ;;  %v560_v45 = vadd.f32 %v790_v38, %v549_v43  ;;  %v564_v46 = vld [vmem:[%s1254_s11 + $0x10] sm:$0xff]  ;;  %v565_v47 = vld [vmem:[%s1254_s11 + $0x18] sm:$0xff] }
 0x142   : > { %v547_v36 = vld [vmem:[#allocation2 + $0x10] sm:$0xff] }
 0x143   : > { %v558_v39 = vadd.f32 %v790_v38, %v547_v36  ;;  %v568_v51 = vadd.f32 %v564_v46, %v560_v45 }
 0x144   : > { %v550_v44 = vld [vmem:[#allocation2 + $0x8] sm:$0xff] }
 0x145   : > { %v566_v48 = vadd.f32 %v562_v41, %v558_v39  ;;  %v561_v50 = vadd.f32 %v790_v38, %v550_v44  ;;  %v793_v55 = vmul.f32 -1.442695, %v568_v51 }
 0x146   : > { %v548_v37 = vld [vmem:[#allocation2] sm:$0xff] }
 0x147   : > { %v559_v40 = vadd.f32 %v790_v38, %v548_v37  ;;  %v791_v52 = vmul.f32 -1.442695, %v566_v48  ;;  %v569_v54 = vadd.f32 %v565_v47, %v561_v50 }
 0x149   : > { %v567_v49 = vadd.f32 %v563_v42, %v559_v40  ;;  %977 = vpow2.f32 %v791_v52  ;;  %v794_v56 = vmul.f32 -1.442695, %v569_v54 }
 0x14b   : > { %v792_v53 = vmul.f32 -1.442695, %v567_v49 }
 0x14d   : > { %979 = vpow2.f32 %v792_v53 }
 0x14e   : > { %981 = vpow2.f32 %v793_v55 }
 0x14f   : > { %983 = vpow2.f32 %v794_v56 }
 0x156   : > { %v978_v57 = vpop.eup %977 }
 0x157   : > { %v582_v59 = vadd.f32 1.0, %v978_v57 }
 0x159   : > { %985 = vrcp.f32 %v582_v59 }
 0x15a   : > { %v980_v58 = vpop.eup %979 }
 0x15b   : > { %v982_v60 = vpop.eup %981  ;;  %v583_v61 = vadd.f32 1.0, %v980_v58 }
 0x15c   : > { %v984_v62 = vpop.eup %983  ;;  %v584_v63 = vadd.f32 1.0, %v982_v60 }
 0x15d   : > { %987 = vrcp.f32 %v583_v61  ;;  %v585_v0 = vadd.f32 1.0, %v984_v62 }
 0x15e   : > { %989 = vrcp.f32 %v584_v63 }
 0x15f   : > { %991 = vrcp.f32 %v585_v0 }
 0x166   : > { %v986_v1 = vpop.eup %985 }
 0x16a   : > { %v988_v2 = vpop.eup %987 }
 0x16b   : > { %v990_v3 = vpop.eup %989  ;;  %v809_v4 = vpack.c.bf16 %v988_v2, %v986_v1 }
 0x16c   : > { %v992_v5 = vpop.eup %991 }
 0x16d   : > { %810 = vst [vmem:[%s1259_s7] sm:$0xff] %v809_v4   ;;  %v814_v6 = vpack.c.bf16 %v992_v5, %v990_v3 }
 0x16f   : > { %816 = vst [vmem:[%s1259_s7 + $0x8] sm:$0xff] %v814_v6  }
 0x170 PF: > { %s14_s21 = sadd.s32 1, %s1079_s21   ;;  %s1311_s15 = smov %s1059_s16 }
 0x171   : > { %p11_p8 = scmp.ge.s32.totalorder %s14_s21, 8   ;;  %s1312_s16 = smov %s1190_s28 }
 0x172   : > { %s1313_s17 = smov %s1071_s19  ;;  %s1314_s18 = smov %s1075_s20 }
 0x173   : > { %s1315_s19 = smov %s1318_s22  ;;  %s1316_s20 = smov %s1322_s23 }
 0x174   :  { %13 = sbr.rel (!%p11_p8) target bundleno = 4 (0x4), region = 161 }

</bundles_post_ra>
